<compile_context>
chip_gen: v5e
topology: v5e:2x2
jax: 0.10.0
libtpu: 0.0.40
codegen_flags: <defaults>
</compile_context>

<pallas_src>
import jax
import jax.numpy as jnp
from jax.experimental import pallas as pl
from jax.experimental.pallas import tpu as pltpu


def _split_cat_kernel(x_ref, o_ref):
    # x_ref: (B, 10) VMEM, o_ref: (B, 8) VMEM — example rows on sublanes,
    # the size-10 "split" axis on lanes.
    x = x_ref[...]                     # single vld of the whole tile
    lo = x[:, 0:8]                     # input rows 0..7  -> output rows 0..3
    hi = x[:, 2:10]                    # input rows 2..9  -> output rows 4..7 (= input 6..9)
    col = jax.lax.broadcasted_iota(jnp.int32, lo.shape, 1)
    o_ref[...] = jnp.where(col < 4, lo, hi)   # one select, one store


def _split_cat_call(x_lane):
    """x_lane: (B, 10) lane-major -> (B, 8). Gridless, full-VMEM BlockSpecs."""
    b = x_lane.shape[0]
    nbytes = x_lane.dtype.itemsize
    bytes_accessed = b * 10 * nbytes + b * 8 * nbytes   # 72 B for B=1 f32
    return pl.pallas_call(
        _split_cat_kernel,
        out_shape=jax.ShapeDtypeStruct((b, 8), x_lane.dtype),
        in_specs=[pl.BlockSpec(memory_space=pltpu.MemorySpace.VMEM)],
        out_specs=pl.BlockSpec(memory_space=pltpu.MemorySpace.VMEM),
        cost_estimate=pl.CostEstimate(
            flops=0, transcendentals=0, bytes_accessed=bytes_accessed),
    )(x_lane)


def split_cat_forward(x):
    """Module-faithful path: x (10, 1) -> (8, 1).

    The (10,1)->(1,10) and (1,8)->(8,1) reshapes are bitcasts (identical
    row-major linear layout), not relayout ops.
    """
    assert x.shape == (10, 1), (
        "This kernel encodes the intended 5x2 split + cat of chunks {0,1,3,4}; "
        "input must be (10, 1).")
    return _split_cat_call(x.reshape(1, 10)).reshape(8, 1)


def split_cat_forward_batched(xb):
    """Amortized path: xb (B, 10, 1) -> (B, 8, 1) in a single kernel call.

    Prefer B a multiple of 8 so the sublane tiles are full. For B in the
    thousands, add a 1-D grid over sublane tiles of B with
    dimension_semantics=("parallel",); below that, gridless is fastest.
    """
    b = xb.shape[0]
    assert xb.shape == (b, 10, 1)
    return _split_cat_call(xb.reshape(b, 10)).reshape(b, 8, 1)


if __name__ == "__main__":
    key = jax.random.PRNGKey(0)
    k_single, k_batch = jax.random.split(key)

    # --- single example (faithful to the module's forward) -----------------
    x = jax.random.normal(k_single, (10, 1), dtype=jnp.float32)
    out = jax.block_until_ready(split_cat_forward(x))
    ref = jnp.concatenate([x[0:2], x[2:4], x[6:8], x[8:10]], axis=0)
    assert out.shape == (8, 1)
    assert jnp.allclose(out, ref)

    # --- batched demo: 8 examples, one kernel call (amortizes launch cost) -
    B = 8
    xb = jax.random.normal(k_batch, (B, 10, 1), dtype=jnp.float32)
    outb = jax.block_until_ready(split_cat_forward_batched(xb))
    refb = jnp.concatenate([xb[:, 0:2], xb[:, 2:4], xb[:, 6:8], xb[:, 8:10]],
                           axis=1)
    assert outb.shape == (B, 8, 1)
    assert jnp.allclose(outb, refb)

    print("KERNEL_OK")
</pallas_src>

<mosaic_0001>
module attributes {stable_mosaic.version = 11 : i64} {
  func.func @_split_cat_kernel(%arg0: memref<1x10xf32, #tpu.memory_space<vmem>>, %arg1: memref<1x8xf32, #tpu.memory_space<vmem>>) attributes {dimension_semantics = [], scalar_prefetch = 0 : i64, scratch_operands = 0 : i64, tpu.core_type = #tpu.core_type<tc>} {
    %c0 = arith.constant 0 : index
    %c0_0 = arith.constant 0 : index
    %0 = vector.load %arg0[%c0, %c0_0] : memref<1x10xf32, #tpu.memory_space<vmem>>, vector<1x10xf32>
    %1 = vector.extract_strided_slice %0 {offsets = [0, 0], sizes = [1, 8], strides = [1, 1]} : vector<1x10xf32> to vector<1x8xf32>
    %2 = vector.extract_strided_slice %0 {offsets = [0, 2], sizes = [1, 8], strides = [1, 1]} : vector<1x10xf32> to vector<1x8xf32>
    %3 = tpu.iota {dimensions = array<i32: 1>} : vector<1x8xi32>
    %c4_i32 = arith.constant 4 : i32
    %4 = vector.broadcast %c4_i32 : i32 to vector<1x8xi32>
    %5 = arith.cmpi slt, %3, %4 : vector<1x8xi32>
    %6 = arith.select %5, %1, %2 : vector<1x8xi1>, vector<1x8xf32>
    %c0_1 = arith.constant 0 : index
    %c0_2 = arith.constant 0 : index
    %7 = vector.load %arg1[%c0_1, %c0_2] : memref<1x8xf32, #tpu.memory_space<vmem>>, vector<1x8xf32>
    tpu.vector_store %arg1[%c0_1, %c0_2], %6 {strides = array<i32>} : memref<1x8xf32, #tpu.memory_space<vmem>>, vector<1x8xf32>,
    return
  }
}

</mosaic_0001>

<bundles_post_ra>
// kernel: tpu_custom_call.1
= control target key start
LH: loop header
LB: loop body
LE: loop exit
PB: predicated region body
PF: predicated region fallthrough
CT: control target
= control target key end

     0   :  { %6 = vsyncpa [#allocation3], 0  ;;  %s127_s0 = inlined_call_operand.hbm [shape: f32[1,10], index: 0, kind: input, shape index: {}]   ;;  %s128_s1 = inlined_call_operand.hbm [shape: f32[1,8], index: 1, kind: output, shape index: {}]  }
   0x1   :  { %7 = vsyncpa [#allocation4], 0  ;;  %s13_s8 = sshll.u32 %s127_s0, 4  ;;  %s108_s9 = smov [#allocation2]   ;;  %s14_s8 = int_to_ptr.hbm [resolvable:$true] %s13_s8 }
   0x2   :  { %s15_s10 = sshll.u32 %s108_s9, 4  ;;  %s16_s10 = int_to_ptr.vmem [resolvable:$true] %s15_s10 }
   0x3   :  { %18 = dma.hbm_to_vmem [thread:$0]  %s14_s8, 16, %s16_s10, [#allocation3]  }
   0x4   :  { %104 = dma.done.wait [#allocation3], 16  }
   0x5   :  { %105 = vsyncadd [#allocation3], 4294967280  ;;  %v55_v0 = vld [vmem:[#allocation2] ss:$0 sm:$0xff]  ;;  %s109_s11 = smov 126   ;;  %v24_v1 = vlaneseq  ;;  %s110_s12 = smov [#allocation5]  }
   0x6   :  { %29 = vrot.lane.b32.xlu0 %v55_v0, %s109_s11  ;;  %s40_s13 = sshll.u32 %s110_s12, 4  ;;  %s42_s16 = sshll.u32 %s128_s1, 4  ;;  %v23_v3 = vld [vmem:[#allocation2] sm:$0x1]  ;;  %vm33_vm1 = vcmask 57344   ;;  %s41_s13 = int_to_ptr.vmem [resolvable:$true] %s40_s13  ;;  %s43_s16 = int_to_ptr.hbm [resolvable:$true] %s42_s16 }
   0x7   :  { %v25_v2 = vand.u32 127, %v24_v1 }
   0x9   :  { %vm26_vm0 = vcmp.lt.s32.totalorder %v25_v2, 4 }
  0x78   :  { %v30_v4 = vpop.permute.xlu0 %29 }
  0x79   :  { %v32_v5 = vsel %vm26_vm0, %v23_v3, %v30_v4 }
  0x7a   :  { %34 = vst.msk [vmem:[#allocation5] sm:$0x1] %vm33_vm1, %v32_v5 }
  0x7b   :  { %45 = dma.vmem_to_hbm [thread:$0]  %s41_s13, 16, %s43_s16, [#allocation4]  }
  0x7c   :  { %106 = dma.done.wait [#allocation4], 16  }
  0x7d   :  { %107 = vsyncadd [#allocation4], 4294967280 }
  0x7e   :  { %50 = vsyncpa [#allocation3], 1 }
  0x7f   :  { %51 = vsyncpa [#allocation4], 1 }

</bundles_post_ra>
